<compile_context>
chip_gen: v7x
topology: tpu7x:2x2x1
jax: 0.10.0
libtpu: 0.0.40
codegen_flags: <defaults>
</compile_context>

<pallas_src>
import functools

import jax
import jax.numpy as jnp
from jax.experimental import pallas as pl
from jax.experimental.pallas import tpu as pltpu


def _scaled_sigmoid_kernel(lam_ref, x_ref, o_ref):
    # lam_ref: (1,) f32 scalar in SMEM (runtime lambda, depends on `iteration`)
    lam = lam_ref[0]
    x = x_ref[...].astype(jnp.float32)      # upcast in vregs (free, mem-bound)
    y = jax.nn.sigmoid(lam * x)             # exp on EUP, hidden under DMA
    o_ref[...] = y.astype(o_ref.dtype)      # cast back on store


def _lambda(iteration):
    it = jnp.asarray(iteration, jnp.float32)
    return 1.0 - jnp.float32(0.95) ** (it + 1.0)


def scaled_sigmoid(x, iteration, *,
                   block_bytes=4 * 1024 * 1024,
                   min_pallas_bytes=256 * 1024):
    """y = sigmoid((1 - 0.95**(iteration+1)) * x), elementwise, any shape."""
    orig_shape = x.shape
    orig_dtype = x.dtype
    total = x.size
    itemsize = jnp.dtype(orig_dtype).itemsize

    lam = _lambda(iteration)

    # ---- fast path ----------------------------------------------------------
    # Tiny tensors: pallas_call fixed cost dominates; XLA's fused elementwise
    # op is already at the HBM roofline.
    # Misaligned totals (not a multiple of 128): avoiding pad+slice copies
    # beats any kernel-side win for a mem-bound op, so use plain JAX.
    if (total == 0
            or total % 128 != 0
            or total * itemsize < min_pallas_bytes):
        y = jax.nn.sigmoid(lam * x.astype(jnp.float32))
        return y.astype(orig_dtype)

    # ---- tile selection -----------------------------------------------------
    rows = total // 128
    x2d = x.reshape(rows, 128)  # bitcast of a contiguous array: no HBM copy

    # Row granularity respecting sublane packing: f32 -> 8, bf16 -> 16, int8 -> 32.
    row_mult = 8 * max(1, 4 // itemsize)
    tile_rows = max(row_mult,
                    (block_bytes // (128 * itemsize)) // row_mult * row_mult)

    if rows <= tile_rows:
        # Single block covering the full sublane extent (block dim == array
        # dim, so any row count is legal). No forced split: on 1-TC chips an
        # extra grid step is pure overhead.
        tile_rows = rows
        num_tiles = 1
    else:
        # Ragged last block (if any) is clamped/masked by Pallas.
        num_tiles = pl.cdiv(rows, tile_rows)

    # ---- pallas call --------------------------------------------------------
    cost = pl.CostEstimate(
        flops=4 * total,                      # mul + exp-adjacent VALU work
        transcendentals=total,                # one exp per element
        bytes_accessed=2 * total * itemsize,  # read x + write y
    )

    out2d = pl.pallas_call(
        _scaled_sigmoid_kernel,
        out_shape=jax.ShapeDtypeStruct((rows, 128), orig_dtype),
        grid_spec=pl.GridSpec(
            grid=(num_tiles,),
            in_specs=[
                pl.BlockSpec(memory_space=pltpu.MemorySpace.SMEM),  # lambda
                pl.BlockSpec((tile_rows, 128), lambda i: (i, 0)),
            ],
            out_specs=pl.BlockSpec((tile_rows, 128), lambda i: (i, 0)),
        ),
        compiler_params=pltpu.CompilerParams(
            dimension_semantics=("parallel",),
            # 4 MiB blocks * 2 arrays * 2 buffers = 16 MiB; raise the scoped
            # limit explicitly so v5e's 16 MiB default is never a problem.
            vmem_limit_bytes=32 * 1024 * 1024,
        ),
        cost_estimate=cost,
    )(lam.reshape(1).astype(jnp.float32), x2d)

    return out2d.reshape(orig_shape)


def _reference(x, iteration):
    lam = _lambda(iteration)
    return jax.nn.sigmoid(lam * x.astype(jnp.float32)).astype(x.dtype)


if __name__ == "__main__":
    key = jax.random.PRNGKey(0)
    iteration = 3

    # 1) Spec-implied small NCHW input; force the Pallas path so the kernel
    #    itself is exercised (single-block path, rows == 16).
    x = jax.random.normal(key, (2, 4, 16, 16), dtype=jnp.float32)
    y = jax.block_until_ready(scaled_sigmoid(x, iteration, min_pallas_bytes=0))
    assert y.shape == x.shape and y.dtype == x.dtype
    assert jnp.allclose(y, _reference(x, iteration), atol=1e-5, rtol=1e-5)

    # 2) Same input through the default tiny-input fast path.
    y_fast = jax.block_until_ready(scaled_sigmoid(x, iteration))
    assert jnp.allclose(y_fast, _reference(x, iteration), atol=1e-5, rtol=1e-5)

    # 3) Multi-tile grid with a ragged last block (rows=1000, tile_rows=128,
    #    8 tiles, last block only 104 valid rows) -- no padding copies.
    x3 = jax.random.normal(jax.random.fold_in(key, 1), (1000, 128),
                           dtype=jnp.float32)
    y3 = jax.block_until_ready(
        scaled_sigmoid(x3, iteration, block_bytes=64 * 1024,
                       min_pallas_bytes=0))
    assert jnp.allclose(y3, _reference(x3, iteration), atol=1e-5, rtol=1e-5)

    # 4) Size not a multiple of 128 -> plain-JAX fallback path.
    x4 = jax.random.normal(jax.random.fold_in(key, 2), (3, 5, 7),
                           dtype=jnp.float32)
    y4 = jax.block_until_ready(scaled_sigmoid(x4, iteration))
    assert jnp.allclose(y4, _reference(x4, iteration), atol=1e-5, rtol=1e-5)

    print("KERNEL_OK")
</pallas_src>

<mosaic_0001>
module attributes {stable_mosaic.version = 11 : i64} {
  func.func @_scaled_sigmoid_kernel(%arg0: i32, %arg1: memref<1xf32, #tpu.memory_space<smem>>, %arg2: memref<16x128xf32, #tpu.memory_space<vmem>>, %arg3: memref<16x128xf32, #tpu.memory_space<vmem>>) attributes {dimension_semantics = [#tpu.dimension_semantics<parallel>], iteration_bounds = array<i64: 1>, scalar_prefetch = 0 : i64, scratch_operands = 0 : i64, tpu.core_type = #tpu.core_type<tc>, window_params = [{transform_indices = @transform_0, window_bounds = array<i64: 1>}, {transform_indices = @transform_1, window_bounds = array<i64: 16, 128>}, {transform_indices = @transform_2, window_bounds = array<i64: 16, 128>}]} {
    %c0 = arith.constant 0 : index
    %0 = memref.load %arg1[%c0] : memref<1xf32, #tpu.memory_space<smem>>
    %c0_0 = arith.constant 0 : index
    %c0_1 = arith.constant 0 : index
    %1 = vector.load %arg2[%c0_0, %c0_1] : memref<16x128xf32, #tpu.memory_space<vmem>>, vector<16x128xf32>
    %2 = vector.broadcast %0 : f32 to vector<16x128xf32>
    %3 = arith.mulf %2, %1 : vector<16x128xf32>
    %4 = arith.negf %3 : vector<16x128xf32>
    %5 = math.exp %4 : vector<16x128xf32>
    %cst = arith.constant 1.000000e+00 : f32
    %6 = vector.broadcast %cst : f32 to vector<16x128xf32>
    %7 = arith.addf %6, %5 : vector<16x128xf32>
    %8 = arith.divf %6, %7 : vector<16x128xf32>
    %c0_2 = arith.constant 0 : index
    %c0_3 = arith.constant 0 : index
    %9 = vector.load %arg3[%c0_2, %c0_3] : memref<16x128xf32, #tpu.memory_space<vmem>>, vector<16x128xf32>
    tpu.vector_store %arg3[%c0_2, %c0_3], %8 {strides = array<i32>} : memref<16x128xf32, #tpu.memory_space<vmem>>, vector<16x128xf32>,
    return
  }
  func.func @transform_0(%arg0: i32) -> i32 {
    %c0_i32 = arith.constant 0 : i32
    %c0_i32_0 = arith.constant 0 : i32
    return %c0_i32 : i32
  }
  func.func @transform_1(%arg0: i32) -> (i32, i32) {
    %c0_i32 = arith.constant 0 : i32
    %c0_i32_0 = arith.constant 0 : i32
    return %arg0, %c0_i32 : i32, i32
  }
  func.func @transform_2(%arg0: i32) -> (i32, i32) {
    %c0_i32 = arith.constant 0 : i32
    %c0_i32_0 = arith.constant 0 : i32
    return %arg0, %c0_i32 : i32, i32
  }
}

</mosaic_0001>

<bundles_post_ra>
// kernel: tpu_custom_call.1
= control target key start
LH: loop header
LB: loop body
LE: loop exit
PB: predicated region body
PF: predicated region fallthrough
CT: control target
= control target key end

     0   :  { %8 = vsyncpa [#allocation4], 0  ;;  %s178_s0 = inlined_call_operand.<no memory space> [shape: f32[1], index: 0, kind: input, shape index: {}]   ;;  %s179_s1 = inlined_call_operand.hbm [shape: f32[16,128], index: 1, kind: input, shape index: {}]   ;;  %s180_s2 = inlined_call_operand.hbm [shape: f32[16,128], index: 2, kind: output, shape index: {}]  }
   0x1   :  { %9 = vsyncpa [#allocation5], 0  ;;  %s126_s9 = smov [#allocation3]   ;;  %s78_s13 = scalar_lea.hbm %s179_s1, 256 }
   0x2   :  { %s17_s10 = sshll.u32 %s126_s9, 4  ;;  %p79_p0 = scmp.ne.s32.totalorder %s179_s1, %s78_s13  ;;  %s18_s10 = int_to_ptr.vmem [resolvable:$true] %s17_s10 }
   0x3   :  { %p82_p1 = scmp.lt.u32.totalorder %s78_s13, %s179_s1 }
   0x5   :  { %p84_p2 = pnand %p82_p1, %p79_p0 }
   0x7   :  { %87 = shalt.err (!%p84_p2)
}
   0x8   :  { %s88_s18 = scalar_lea.vmem %s18_s10, 256  ;;  %p93_p4 = scmp.lt.s32.totalorder %s18_s10, %s18_s10 }
   0x9   :  { %p89_p3 = scmp.ne.s32.totalorder %s18_s10, %s88_s18  ;;  %p94_p5 = scmp.lt.s32.totalorder %s88_s18, %s88_s18 }
   0xb   :  { %p95_p6 = por %p94_p5, %p93_p4 }
   0xd   :  { %p96_p7 = pnand %p95_p6, %p89_p3 }
   0xf   :  { %99 = shalt.err (!%p96_p7)
}
  0x10   :  { %s127_s19 = smov 128   ;;  %s128_s20 = smov 8  }
  0x11   :  { %23 = dma.hbm_to_vmem [thread:$0]  %s179_s1, 256, %s18_s10, [#allocation4], %s127_s19, %s127_s19, %s128_s20  }
  0x12   :  { %122 = dma.done.wait [#allocation4], 256  }
  0x13   :  { %123 = vsyncadd [#allocation4], 4294967040  ;;  %v30_v0 = vstv %s178_s0  ;;  %v28_v1 = vld [vmem:[#allocation3] sm:$0xff]  ;;  %v29_v2 = vld [vmem:[#allocation3 + $0x8] sm:$0xff]  ;;  %s129_s1 = smov [#allocation6]  }
  0x14   :  { %v31_v3 = vmul.f32 %v30_v0, %v28_v1  ;;  %v32_v4 = vmul.f32 %v30_v0, %v29_v2  ;;  %s52_s25 = sshll.u32 %s129_s1, 4  ;;  %s53_s25 = int_to_ptr.vmem [resolvable:$true] %s52_s25 }
  0x15   :  { %s100_s0 = scalar_lea.vmem %s53_s25, 256  ;;  %p105_p9 = scmp.lt.s32.totalorder %s53_s25, %s53_s25 }
  0x16   :  { %v64_v5 = vmul.f32 -1.442695, %v31_v3  ;;  %v65_v6 = vmul.f32 -1.442695, %v32_v4  ;;  %p101_p8 = scmp.ne.s32.totalorder %s53_s25, %s100_s0  ;;  %p106_p10 = scmp.lt.s32.totalorder %s100_s0, %s100_s0 }
  0x18   :  { %70 = vpow2.f32 %v64_v5  ;;  %p107_p11 = por %p106_p10, %p105_p9 }
  0x19   :  { %72 = vpow2.f32 %v65_v6 }
  0x1a   :  { %p108_p12 = pnand %p107_p11, %p101_p8 }
  0x22   :  { %v71_v7 = vpop.eup %70 }
  0x23   :  { %v73_v8 = vpop.eup %72  ;;  %v39_v9 = vadd.f32 1.0, %v71_v7 }
  0x24   :  { %v40_v10 = vadd.f32 1.0, %v73_v8 }
  0x25   :  { %74 = vrcp.f32 %v39_v9 }
  0x26   :  { %76 = vrcp.f32 %v40_v10 }
  0x2f   :  { %v75_v11 = vpop.eup %74 }
  0x30   :  { %v77_v12 = vpop.eup %76  ;;  %45 = vst [vmem:[#allocation6] sm:$0xff] %v75_v11 }
  0x31   :  { %46 = vst [vmem:[#allocation6 + $0x8] sm:$0xff] %v77_v12 }
  0x32   :  { %111 = shalt.err (!%p108_p12)
}
  0x33   :  { %s112_s28 = scalar_lea.hbm %s180_s2, 256 }
  0x34   :  { %p113_p13 = scmp.ne.s32.totalorder %s180_s2, %s112_s28  ;;  %p116_p0 = scmp.lt.u32.totalorder %s112_s28, %s180_s2 }
  0x36   :  { %p118_p1 = pnand %p116_p0, %p113_p13 }
  0x38   :  { %121 = shalt.err (!%p118_p1)
}
  0x39   :  { %58 = dma.vmem_to_hbm [thread:$0]  %s53_s25, 256, %s180_s2, [#allocation5], %s127_s19, %s127_s19, %s128_s20  }
  0x3a   :  { %124 = dma.done.wait [#allocation5], 256  }
  0x3b   :  { %125 = vsyncadd [#allocation5], 4294967040 }
  0x3c   :  { %62 = vsyncpa [#allocation4], 1 }
  0x3d   :  { %63 = vsyncpa [#allocation5], 1 }

</bundles_post_ra>
